<compile_context>
chip_gen: v7x
topology: tpu7x:2x2x1
jax: 0.10.0
libtpu: 0.0.40
codegen_flags: <defaults>
</compile_context>

<pallas_src>
import math

import jax
import jax.numpy as jnp
from jax import lax
from jax.experimental import pallas as pl
from jax.experimental.pallas import tpu as pltpu

_HI = lax.Precision.HIGHEST


def _make_kernel(*, n, bs, seq_len, d_embed, d_model, d_k, has_ln_affine):
    S, E, D = seq_len, d_embed, d_model
    inv_sqrt_dk = 1.0 / math.sqrt(d_k)
    inv_cnt = 1.0 / (S * E)

    def kernel(*refs):
        if has_ln_affine:
            x_ref, w_ref, noise_ref, ln_ref, o_ref = refs
        else:
            x_ref, w_ref, noise_ref, o_ref = refs

        xf = x_ref[...]                                  # (bs*S, E)
        w_qkv = w_ref[:, : 3 * D]                        # (E, 3D)  [wq|wk|wv]
        w_fct = w_ref[:, 3 * D: 4 * D]                   # (E, D)   wfc^T
        noise_qkv = noise_ref[:, : 3 * D]                # (bs*S, 3D)
        noise_fc = noise_ref[:, 3 * D: 3 * D + E]        # (bs*S, E)

        # Fused Q/K/V projection for every batch in this step: one MXU pass, one bias add.
        qkv = (jnp.dot(xf, w_qkv, preferred_element_type=jnp.float32, precision=_HI)
               + noise_qkv)
        # Lane-offset slices hoisted out of the per-batch loop (each relayout happens once).
        q_all = qkv[:, 0:D]
        k_all = qkv[:, D:2 * D]
        v_all = qkv[:, 2 * D:3 * D]

        # PadMasking (static n -> constant mask): keep [0:n, 0:n], everything else -> -1e9.
        row = lax.broadcasted_iota(jnp.int32, (S, S), 0)
        col = lax.broadcasted_iota(jnp.int32, (S, S), 1)
        keep = (row < n) & (col < n)

        # Per-batch attention (bs is tiny; fully unrolled).  Row slices at b*S are sublane-aligned.
        aos = []
        for b in range(bs):
            r0 = b * S
            q = q_all[r0:r0 + S, :]
            k = k_all[r0:r0 + S, :]
            v = v_all[r0:r0 + S, :]
            # Q @ K^T by contracting the last dims directly (no K transpose / XLU traffic).
            s = lax.dot_general(q, k, (((1,), (1,)), ((), ())),
                                precision=_HI,
                                preferred_element_type=jnp.float32) * inv_sqrt_dk
            s = jnp.where(keep, s, jnp.float32(-1e9))
            s = s - jnp.max(s, axis=-1, keepdims=True)
            p = jnp.exp(s)
            attn = p / jnp.sum(p, axis=-1, keepdims=True)     # exact divide (correctness)
            aos.append(jnp.dot(attn, v, preferred_element_type=jnp.float32, precision=_HI))

        # Output FC hoisted out of the loop: one (bs*S, D) x (D, E) MXU pass + one add.
        ao_all = aos[0] if bs == 1 else jnp.concatenate(aos, axis=0)
        out = (lax.dot_general(ao_all, w_fct, (((1,), (1,)), ((), ())),
                               precision=_HI, preferred_element_type=jnp.float32)
               + noise_fc + xf)

        if has_ln_affine:
            ln_w = ln_ref[0:S, :]
            ln_b = ln_ref[S:2 * S, :]

        # LayerNorm over the last two dims ([seq_len, d_embed]) per batch, eps=1e-5.
        for b in range(bs):
            r0 = b * S
            o = out[r0:r0 + S, :]
            mu = jnp.sum(o, keepdims=True) * inv_cnt           # (1, 1)
            d = o - mu
            var = jnp.sum(d * d, keepdims=True) * inv_cnt      # (1, 1)
            y = d * lax.rsqrt(var + jnp.float32(1e-5))
            if has_ln_affine:
                y = y * ln_w + ln_b
            o_ref[r0:r0 + S, :] = y

    return kernel


def decoder_multihead_attn(x, n, params, *, batch_per_step=None):
    """x: (B, S, E) f32; n: static Python int; params: weights + forward-time FCLayer noise.

    batch_per_step: batches handled per grid step.  Default B (single grid step) is best on
    single-TensorCore chips (v5e/v6e).  On v7x keep a single step at small B; for larger B pass
    batch_per_step = B // 2 (B even) so the grid is exactly two "parallel" steps, one per TC.
    """
    B, S, E = x.shape
    D = params["wq"].shape[1]
    d_k = params["d_k"]
    if not isinstance(n, int):
        raise TypeError("n must be a static Python int (baked into the kernel); "
                        "use a scalar-prefetch variant if n varies at runtime.")
    bs = B if batch_per_step is None else batch_per_step
    assert B % bs == 0 and (bs * S) % 8 == 0

    # Host-side fusion (done once):
    #   weights -> (E, 4D) lane-dense slab [wq | wk | wv | wfc^T]
    #   noise   -> (B*S, 3D+E) slab        [bq | bk | bv | bfc]
    w_slab = jnp.concatenate(
        [params["wq"], params["wk"], params["wv"], params["wfc"].T], axis=1)
    noise = jnp.concatenate(
        [params["bq"], params["bk"], params["bv"], params["bfc"]], axis=-1
    ).reshape(B * S, 3 * D + E)
    x_flat = x.reshape(B * S, E)

    ln_w = params.get("ln_w")
    ln_b = params.get("ln_b")
    has_ln_affine = (ln_w is not None) or (ln_b is not None)

    in_specs = [
        pl.BlockSpec((bs * S, E), lambda i: (i, 0)),              # x (flattened)
        pl.BlockSpec((E, 4 * D), lambda i: (0, 0)),               # fused weight slab
        pl.BlockSpec((bs * S, 3 * D + E), lambda i: (i, 0)),      # fused noise slab
    ]
    args = [x_flat, w_slab, noise]
    if has_ln_affine:
        if ln_w is None:
            ln_w = jnp.ones((S, E), jnp.float32)
        if ln_b is None:
            ln_b = jnp.zeros((S, E), jnp.float32)
        ln_slab = jnp.concatenate([ln_w, ln_b], axis=0)           # (2S, E) 2-D block
        in_specs.append(pl.BlockSpec((2 * S, E), lambda i: (0, 0)))
        args.append(ln_slab)

    kernel = _make_kernel(n=n, bs=bs, seq_len=S, d_embed=E, d_model=D, d_k=d_k,
                          has_ln_affine=has_ln_affine)

    grid_spec = pltpu.PrefetchScalarGridSpec(
        num_scalar_prefetch=0,
        grid=(B // bs,),
        in_specs=in_specs,
        # Output left as (B*S, E): 2 KiB total at these sizes, lane-dense relayout not worth it.
        out_specs=pl.BlockSpec((bs * S, E), lambda i: (i, 0)),
    )

    out_flat = pl.pallas_call(
        kernel,
        out_shape=jax.ShapeDtypeStruct((B * S, E), jnp.float32),
        grid_spec=grid_spec,
        compiler_params=pltpu.CompilerParams(dimension_semantics=("parallel",)),
    )(*args)
    return out_flat.reshape(B, S, E)


def reference_forward(x, n, params):
    """Plain-JAX reference mirroring the PyTorch forward (HIGHEST matmul precision)."""
    d_k = params["d_k"]
    S = x.shape[1]
    q = jnp.matmul(x, params["wq"], precision=_HI) + params["bq"]
    k = jnp.matmul(x, params["wk"], precision=_HI) + params["bk"]
    v = jnp.matmul(x, params["wv"], precision=_HI) + params["bv"]
    scores = jnp.einsum("bqd,bkd->bqk", q, k, precision=_HI) / math.sqrt(d_k)
    row = jnp.arange(S)[:, None]
    col = jnp.arange(S)[None, :]
    keep = (row < n) & (col < n)
    scores = jnp.where(keep[None], scores, -1e9)
    attn = jax.nn.softmax(scores, axis=-1)
    ao = jnp.einsum("bqk,bkd->bqd", attn, v, precision=_HI)
    out = jnp.matmul(ao, params["wfc"], precision=_HI) + params["bfc"] + x
    mu = jnp.mean(out, axis=(1, 2), keepdims=True)
    var = jnp.mean((out - mu) ** 2, axis=(1, 2), keepdims=True)
    norm = (out - mu) / jnp.sqrt(var + 1e-5)
    ln_w = params.get("ln_w")
    ln_b = params.get("ln_b")
    if ln_w is not None:
        norm = norm * ln_w[None]
    if ln_b is not None:
        norm = norm + ln_b[None]
    return norm


if __name__ == "__main__":
    # Small shapes consistent with the module (PadMasking requires seq_len == S).
    B, S, d_embed, d_k, h1 = 2, 8, 32, 8, 4
    d_model = d_k * h1
    n = 5

    key = jax.random.PRNGKey(0)
    keys = jax.random.split(key, 9)

    x = jax.random.normal(keys[0], (B, S, d_embed), dtype=jnp.float32)

    params = {
        "d_k": d_k,
        # FCLayer weight matrices (torch.randn at __init__) -- deterministic synthetic init.
        "wq": jax.random.normal(keys[1], (d_embed, d_model), dtype=jnp.float32),
        "wk": jax.random.normal(keys[2], (d_embed, d_model), dtype=jnp.float32),
        "wv": jax.random.normal(keys[3], (d_embed, d_model), dtype=jnp.float32),
        "wfc": jax.random.normal(keys[4], (d_model, d_embed), dtype=jnp.float32),
        # FCLayer forward-time additive noise (torch.randn(x.size()) per forward call),
        # drawn deterministically here and fed into the kernel.
        "bq": jax.random.normal(keys[5], (B, S, d_model), dtype=jnp.float32),
        "bk": jax.random.normal(keys[6], (B, S, d_model), dtype=jnp.float32),
        "bv": jax.random.normal(keys[7], (B, S, d_model), dtype=jnp.float32),
        "bfc": jax.random.normal(keys[8], (B, S, d_embed), dtype=jnp.float32),
        # nn.LayerNorm([seq_len, d_embed]) default affine init (weight=1, bias=0): the identity
        # affine is folded away (no ln operand).  Pass "ln_w"/"ln_b" to exercise the affine path.
    }

    out = decoder_multihead_attn(x, n, params)
    out = jax.block_until_ready(out)

    ref = reference_forward(x, n, params)
    assert out.shape == (B, S, d_embed)
    max_err = float(jnp.max(jnp.abs(out - ref)))
    assert jnp.allclose(out, ref, atol=2e-3, rtol=2e-3), (
        f"mismatch vs. pure-JAX reference (max abs err {max_err:.3e})")

    print("KERNEL_OK")
</pallas_src>

<mosaic_0001>
module attributes {stable_mosaic.version = 11 : i64} {
  func.func @kernel(%arg0: i32, %arg1: memref<16x32xf32, #tpu.memory_space<vmem>>, %arg2: memref<32x128xf32, #tpu.memory_space<vmem>>, %arg3: memref<16x128xf32, #tpu.memory_space<vmem>>, %arg4: memref<16x32xf32, #tpu.memory_space<vmem>>) attributes {dimension_semantics = [#tpu.dimension_semantics<parallel>], iteration_bounds = array<i64: 1>, scalar_prefetch = 0 : i64, scratch_operands = 0 : i64, tpu.core_type = #tpu.core_type<tc>, window_params = [{transform_indices = @transform_0, window_bounds = array<i64: 16, 32>}, {pipeline_mode = #tpu.pipeline_mode<synchronous>, transform_indices = @transform_1, window_bounds = array<i64: 32, 128>}, {transform_indices = @transform_2, window_bounds = array<i64: 16, 128>}, {transform_indices = @transform_3, window_bounds = array<i64: 16, 32>}]} {
    %c0 = arith.constant 0 : index
    %c0_0 = arith.constant 0 : index
    %0 = vector.load %arg1[%c0, %c0_0] : memref<16x32xf32, #tpu.memory_space<vmem>>, vector<16x32xf32>
    %c0_1 = arith.constant 0 : index
    %c0_2 = arith.constant 0 : index
    %1 = vector.load %arg2[%c0_1, %c0_2] : memref<32x128xf32, #tpu.memory_space<vmem>>, vector<32x96xf32>
    %c0_3 = arith.constant 0 : index
    %c96 = arith.constant 96 : index
    %2 = vector.load %arg2[%c0_3, %c96] : memref<32x128xf32, #tpu.memory_space<vmem>>, vector<32x32xf32>
    %c0_4 = arith.constant 0 : index
    %c0_5 = arith.constant 0 : index
    %3 = vector.load %arg3[%c0_4, %c0_5] : memref<16x128xf32, #tpu.memory_space<vmem>>, vector<16x96xf32>
    %c0_6 = arith.constant 0 : index
    %c96_7 = arith.constant 96 : index
    %4 = vector.load %arg3[%c0_6, %c96_7] : memref<16x128xf32, #tpu.memory_space<vmem>>, vector<16x32xf32>
    %cst = arith.constant dense<0.000000e+00> : vector<16x96xf32>
    %5 = tpu.matmul %0, %1, %cst {dimension_numbers = #tpu.dot_dimension_numbers<[1], [0], [0], [1], [0, 0, 1, 1], [], []>, precision = #tpu.contract_precision<fp32>} : vector<16x32xf32>, vector<32x96xf32>, vector<16x96xf32> -> vector<16x96xf32>
    %6 = arith.addf %5, %3 : vector<16x96xf32>
    %7 = vector.extract_strided_slice %6 {offsets = [0, 0], sizes = [16, 32], strides = [1, 1]} : vector<16x96xf32> to vector<16x32xf32>
    %8 = vector.extract_strided_slice %6 {offsets = [0, 32], sizes = [16, 32], strides = [1, 1]} : vector<16x96xf32> to vector<16x32xf32>
    %9 = vector.extract_strided_slice %6 {offsets = [0, 64], sizes = [16, 32], strides = [1, 1]} : vector<16x96xf32> to vector<16x32xf32>
    %10 = tpu.iota {dimensions = array<i32: 0>} : vector<8x8xi32>
    %11 = tpu.iota {dimensions = array<i32: 1>} : vector<8x8xi32>
    %c5_i32 = arith.constant 5 : i32
    %12 = vector.broadcast %c5_i32 : i32 to vector<8x8xi32>
    %13 = arith.cmpi slt, %10, %12 : vector<8x8xi32>
    %c5_i32_8 = arith.constant 5 : i32
    %14 = vector.broadcast %c5_i32_8 : i32 to vector<8x8xi32>
    %15 = arith.cmpi slt, %11, %14 : vector<8x8xi32>
    %16 = arith.andi %13, %15 : vector<8x8xi1>
    %17 = vector.extract_strided_slice %7 {offsets = [0, 0], sizes = [8, 32], strides = [1, 1]} : vector<16x32xf32> to vector<8x32xf32>
    %18 = vector.extract_strided_slice %8 {offsets = [0, 0], sizes = [8, 32], strides = [1, 1]} : vector<16x32xf32> to vector<8x32xf32>
    %19 = vector.extract_strided_slice %9 {offsets = [0, 0], sizes = [8, 32], strides = [1, 1]} : vector<16x32xf32> to vector<8x32xf32>
    %cst_9 = arith.constant dense<0.000000e+00> : vector<8x8xf32>
    %20 = tpu.matmul %17, %18, %cst_9 {dimension_numbers = #tpu.dot_dimension_numbers<[1], [1], [0], [0], [0, 0, 1, 0], [], []>, precision = #tpu.contract_precision<fp32>} : vector<8x32xf32>, vector<8x32xf32>, vector<8x8xf32> -> vector<8x8xf32>
    %cst_10 = arith.constant 0.353553385 : f32
    %21 = vector.broadcast %cst_10 : f32 to vector<8x8xf32>
    %22 = arith.mulf %20, %21 : vector<8x8xf32>
    %cst_11 = arith.constant -1.000000e+09 : f32
    %23 = vector.broadcast %cst_11 : f32 to vector<8x8xf32>
    %24 = arith.select %16, %22, %23 : vector<8x8xi1>, vector<8x8xf32>
    %cst_12 = arith.constant dense<0xFF800000> : vector<8xf32>
    %25 = vector.multi_reduction <maximumf>, %24, %cst_12 [1] : vector<8x8xf32> to vector<8xf32>
    %26 = vector.shape_cast %25 : vector<8xf32> to vector<8x1xf32>
    %27 = vector.broadcast %26 : vector<8x1xf32> to vector<8x8xf32>
    %28 = arith.subf %24, %27 : vector<8x8xf32>
    %29 = math.exp %28 : vector<8x8xf32>
    %cst_13 = arith.constant dense<0.000000e+00> : vector<8xf32>
    %30 = vector.multi_reduction <add>, %29, %cst_13 [1] : vector<8x8xf32> to vector<8xf32>
    %31 = vector.shape_cast %30 : vector<8xf32> to vector<8x1xf32>
    %32 = vector.broadcast %31 : vector<8x1xf32> to vector<8x8xf32>
    %33 = arith.divf %29, %32 : vector<8x8xf32>
    %cst_14 = arith.constant dense<0.000000e+00> : vector<8x32xf32>
    %34 = tpu.matmul %33, %19, %cst_14 {dimension_numbers = #tpu.dot_dimension_numbers<[1], [0], [0], [1], [0, 0, 1, 1], [], []>, precision = #tpu.contract_precision<fp32>} : vector<8x8xf32>, vector<8x32xf32>, vector<8x32xf32> -> vector<8x32xf32>
    %35 = vector.extract_strided_slice %7 {offsets = [8, 0], sizes = [8, 32], strides = [1, 1]} : vector<16x32xf32> to vector<8x32xf32>
    %36 = vector.extract_strided_slice %8 {offsets = [8, 0], sizes = [8, 32], strides = [1, 1]} : vector<16x32xf32> to vector<8x32xf32>
    %37 = vector.extract_strided_slice %9 {offsets = [8, 0], sizes = [8, 32], strides = [1, 1]} : vector<16x32xf32> to vector<8x32xf32>
    %cst_15 = arith.constant dense<0.000000e+00> : vector<8x8xf32>
    %38 = tpu.matmul %35, %36, %cst_15 {dimension_numbers = #tpu.dot_dimension_numbers<[1], [1], [0], [0], [0, 0, 1, 0], [], []>, precision = #tpu.contract_precision<fp32>} : vector<8x32xf32>, vector<8x32xf32>, vector<8x8xf32> -> vector<8x8xf32>
    %cst_16 = arith.constant 0.353553385 : f32
    %39 = vector.broadcast %cst_16 : f32 to vector<8x8xf32>
    %40 = arith.mulf %38, %39 : vector<8x8xf32>
    %cst_17 = arith.constant -1.000000e+09 : f32
    %41 = vector.broadcast %cst_17 : f32 to vector<8x8xf32>
    %42 = arith.select %16, %40, %41 : vector<8x8xi1>, vector<8x8xf32>
    %cst_18 = arith.constant dense<0xFF800000> : vector<8xf32>
    %43 = vector.multi_reduction <maximumf>, %42, %cst_18 [1] : vector<8x8xf32> to vector<8xf32>
    %44 = vector.shape_cast %43 : vector<8xf32> to vector<8x1xf32>
    %45 = vector.broadcast %44 : vector<8x1xf32> to vector<8x8xf32>
    %46 = arith.subf %42, %45 : vector<8x8xf32>
    %47 = math.exp %46 : vector<8x8xf32>
    %cst_19 = arith.constant dense<0.000000e+00> : vector<8xf32>
    %48 = vector.multi_reduction <add>, %47, %cst_19 [1] : vector<8x8xf32> to vector<8xf32>
    %49 = vector.shape_cast %48 : vector<8xf32> to vector<8x1xf32>
    %50 = vector.broadcast %49 : vector<8x1xf32> to vector<8x8xf32>
    %51 = arith.divf %47, %50 : vector<8x8xf32>
    %cst_20 = arith.constant dense<0.000000e+00> : vector<8x32xf32>
    %52 = tpu.matmul %51, %37, %cst_20 {dimension_numbers = #tpu.dot_dimension_numbers<[1], [0], [0], [1], [0, 0, 1, 1], [], []>, precision = #tpu.contract_precision<fp32>} : vector<8x8xf32>, vector<8x32xf32>, vector<8x32xf32> -> vector<8x32xf32>
    %53 = tpu.concatenate %34, %52 in 0 : vector<8x32xf32>, vector<8x32xf32> -> vector<16x32xf32>
    %cst_21 = arith.constant dense<0.000000e+00> : vector<16x32xf32>
    %54 = tpu.matmul %53, %2, %cst_21 {dimension_numbers = #tpu.dot_dimension_numbers<[1], [1], [0], [0], [0, 0, 1, 0], [], []>, precision = #tpu.contract_precision<fp32>} : vector<16x32xf32>, vector<32x32xf32>, vector<16x32xf32> -> vector<16x32xf32>
    %55 = arith.addf %54, %4 : vector<16x32xf32>
    %56 = arith.addf %55, %0 : vector<16x32xf32>
    %57 = vector.extract_strided_slice %56 {offsets = [0, 0], sizes = [8, 32], strides = [1, 1]} : vector<16x32xf32> to vector<8x32xf32>
    %58 = vector.shape_cast %57 : vector<8x32xf32> to vector<1x8x32xf32>
    %cst_22 = arith.constant dense<0.000000e+00> : vector<1xf32>
    %59 = vector.multi_reduction <add>, %58, %cst_22 [1, 2] : vector<1x8x32xf32> to vector<1xf32>
    %60 = vector.shape_cast %59 : vector<1xf32> to vector<1x1x1xf32>
    %61 = vector.extract %60[0, 0, 0] : f32 from vector<1x1x1xf32>
    %62 = vector.broadcast %61 : f32 to vector<1x1xf32>
    %cst_23 = arith.constant 3.906250e-03 : f32
    %63 = vector.broadcast %cst_23 : f32 to vector<1x1xf32>
    %64 = arith.mulf %62, %63 : vector<1x1xf32>
    %65 = vector.broadcast %64 : vector<1x1xf32> to vector<8x32xf32>
    %66 = arith.subf %57, %65 : vector<8x32xf32>
    %67 = arith.mulf %66, %66 : vector<8x32xf32>
    %68 = vector.shape_cast %67 : vector<8x32xf32> to vector<1x8x32xf32>
    %cst_24 = arith.constant dense<0.000000e+00> : vector<1xf32>
    %69 = vector.multi_reduction <add>, %68, %cst_24 [1, 2] : vector<1x8x32xf32> to vector<1xf32>
    %70 = vector.shape_cast %69 : vector<1xf32> to vector<1x1x1xf32>
    %71 = vector.extract %70[0, 0, 0] : f32 from vector<1x1x1xf32>
    %72 = vector.broadcast %71 : f32 to vector<1x1xf32>
    %cst_25 = arith.constant 3.906250e-03 : f32
    %73 = vector.broadcast %cst_25 : f32 to vector<1x1xf32>
    %74 = arith.mulf %72, %73 : vector<1x1xf32>
    %cst_26 = arith.constant 9.99999974E-6 : f32
    %75 = vector.broadcast %cst_26 : f32 to vector<1x1xf32>
    %76 = arith.addf %74, %75 : vector<1x1xf32>
    %77 = math.rsqrt %76 : vector<1x1xf32>
    %78 = vector.broadcast %77 : vector<1x1xf32> to vector<8x32xf32>
    %79 = arith.mulf %66, %78 : vector<8x32xf32>
    %c0_27 = arith.constant 0 : index
    %c0_28 = arith.constant 0 : index
    %80 = vector.load %arg4[%c0_27, %c0_28] : memref<16x32xf32, #tpu.memory_space<vmem>>, vector<8x32xf32>
    tpu.vector_store %arg4[%c0_27, %c0_28], %79 {strides = array<i32>} : memref<16x32xf32, #tpu.memory_space<vmem>>, vector<8x32xf32>,
    %81 = vector.extract_strided_slice %56 {offsets = [8, 0], sizes = [8, 32], strides = [1, 1]} : vector<16x32xf32> to vector<8x32xf32>
    %82 = vector.shape_cast %81 : vector<8x32xf32> to vector<1x8x32xf32>
    %cst_29 = arith.constant dense<0.000000e+00> : vector<1xf32>
    %83 = vector.multi_reduction <add>, %82, %cst_29 [1, 2] : vector<1x8x32xf32> to vector<1xf32>
    %84 = vector.shape_cast %83 : vector<1xf32> to vector<1x1x1xf32>
    %85 = vector.extract %84[0, 0, 0] : f32 from vector<1x1x1xf32>
    %86 = vector.broadcast %85 : f32 to vector<1x1xf32>
    %cst_30 = arith.constant 3.906250e-03 : f32
    %87 = vector.broadcast %cst_30 : f32 to vector<1x1xf32>
    %88 = arith.mulf %86, %87 : vector<1x1xf32>
    %89 = vector.broadcast %88 : vector<1x1xf32> to vector<8x32xf32>
    %90 = arith.subf %81, %89 : vector<8x32xf32>
    %91 = arith.mulf %90, %90 : vector<8x32xf32>
    %92 = vector.shape_cast %91 : vector<8x32xf32> to vector<1x8x32xf32>
    %cst_31 = arith.constant dense<0.000000e+00> : vector<1xf32>
    %93 = vector.multi_reduction <add>, %92, %cst_31 [1, 2] : vector<1x8x32xf32> to vector<1xf32>
    %94 = vector.shape_cast %93 : vector<1xf32> to vector<1x1x1xf32>
    %95 = vector.extract %94[0, 0, 0] : f32 from vector<1x1x1xf32>
    %96 = vector.broadcast %95 : f32 to vector<1x1xf32>
    %cst_32 = arith.constant 3.906250e-03 : f32
    %97 = vector.broadcast %cst_32 : f32 to vector<1x1xf32>
    %98 = arith.mulf %96, %97 : vector<1x1xf32>
    %cst_33 = arith.constant 9.99999974E-6 : f32
    %99 = vector.broadcast %cst_33 : f32 to vector<1x1xf32>
    %100 = arith.addf %98, %99 : vector<1x1xf32>
    %101 = math.rsqrt %100 : vector<1x1xf32>
    %102 = vector.broadcast %101 : vector<1x1xf32> to vector<8x32xf32>
    %103 = arith.mulf %90, %102 : vector<8x32xf32>
    %c8 = arith.constant 8 : index
    %c0_34 = arith.constant 0 : index
    %104 = vector.load %arg4[%c8, %c0_34] : memref<16x32xf32, #tpu.memory_space<vmem>>, vector<8x32xf32>
    tpu.vector_store %arg4[%c8, %c0_34], %103 {strides = array<i32>} : memref<16x32xf32, #tpu.memory_space<vmem>>, vector<8x32xf32>,
    return
  }
  func.func @transform_0(%arg0: i32) -> (i32, i32) {
    %c0_i32 = arith.constant 0 : i32
    %c0_i32_0 = arith.constant 0 : i32
    return %arg0, %c0_i32 : i32, i32
  }
  func.func @transform_1(%arg0: i32) -> (i32, i32) {
    %c0_i32 = arith.constant 0 : i32
    %c0_i32_0 = arith.constant 0 : i32
    %c0_i32_1 = arith.constant 0 : i32
    return %c0_i32, %c0_i32_0 : i32, i32
  }
  func.func @transform_2(%arg0: i32) -> (i32, i32) {
    %c0_i32 = arith.constant 0 : i32
    %c0_i32_0 = arith.constant 0 : i32
    return %arg0, %c0_i32 : i32, i32
  }
  func.func @transform_3(%arg0: i32) -> (i32, i32) {
    %c0_i32 = arith.constant 0 : i32
    %c0_i32_0 = arith.constant 0 : i32
    return %arg0, %c0_i32 : i32, i32
  }
}

</mosaic_0001>

<bundles_post_ra>
// kernel: tpu_custom_call.1
= control target key start
LH: loop header
LB: loop body
LE: loop exit
PB: predicated region body
PF: predicated region fallthrough
CT: control target
= control target key end

     0   :  { %8 = vsyncpa [#allocation3], 0  ;;  %s4038_s0 = inlined_call_operand.hbm [shape: f32[16,32], index: 0, kind: input, shape index: {}]   ;;  %s4039_s1 = inlined_call_operand.hbm [shape: f32[32,128], index: 1, kind: input, shape index: {}]   ;;  %s4040_s2 = inlined_call_operand.hbm [shape: f32[16,128], index: 2, kind: input, shape index: {}]   ;;  %s4041_s3 = inlined_call_operand.hbm [shape: f32[16,32], index: 3, kind: output, shape index: {}]  }
   0x1   :  { %9 = vsyncpa [#allocation6], 0 }
   0x2   :  { %10 = vsyncpa [#allocation4], 0  ;;  %s3742_s12 = smov [#allocation5]   ;;  %s3743_s14 = smov [#allocation2]  }
   0x3   :  { %s28_s13 = sshll.u32 %s3742_s12, 4  ;;  %s16_s15 = sshll.u32 %s3743_s14, 4  ;;  %s29_s13 = int_to_ptr.vmem [resolvable:$true] %s28_s13  ;;  %s3773_s15 = int_to_ptr.vmem [resolvable:$true] %s16_s15 }
   0x4   :  { %s3648_s18 = scalar_lea.hbm %s4039_s1, 512 }
   0x5   :  { %p3649_p0 = scmp.ne.s32.totalorder %s4039_s1, %s3648_s18  ;;  %p3652_p1 = scmp.lt.u32.totalorder %s3648_s18, %s4039_s1 }
   0x7   :  { %p3654_p2 = pnand %p3652_p1, %p3649_p0 }
   0x9   :  { %3657 = shalt.err (!%p3654_p2)
}
   0xa   :  { %s3658_s23 = scalar_lea.vmem %s29_s13, 512  ;;  %p3663_p4 = scmp.lt.s32.totalorder %s29_s13, %s29_s13 }
   0xb   :  { %p3659_p3 = scmp.ne.s32.totalorder %s29_s13, %s3658_s23  ;;  %p3664_p5 = scmp.lt.s32.totalorder %s3658_s23, %s3658_s23 }
   0xd   :  { %p3665_p6 = por %p3664_p5, %p3663_p4 }
   0xf   :  { %p3666_p7 = pnand %p3665_p6, %p3659_p3 }
  0x11   :  { %3669 = shalt.err (!%p3666_p7)
}
  0x12   :  { %s3744_s24 = smov 128   ;;  %s3745_s25 = smov 8  }
  0x13   :  { %34 = dma.hbm_to_vmem [thread:$0]  %s4039_s1, 512, %s29_s13, [#allocation6], %s3744_s24, %s3744_s24, %s3745_s25  }
  0x14   :  { %s3670_s30 = scalar_lea.hbm %s4038_s0, 256 }
  0x15   :  { %p3671_p8 = scmp.ne.s32.totalorder %s4038_s0, %s3670_s30  ;;  %p3674_p9 = scmp.lt.u32.totalorder %s3670_s30, %s4038_s0 }
  0x17   :  { %p3676_p10 = pnand %p3674_p9, %p3671_p8 }
  0x19   :  { %3679 = shalt.err (!%p3676_p10)
}
  0x1a   :  { %s3680_s8 = scalar_lea.vmem %s3773_s15, 256  ;;  %p3685_p12 = scmp.lt.s32.totalorder %s3773_s15, %s3773_s15 }
  0x1b   :  { %p3681_p11 = scmp.ne.s32.totalorder %s3773_s15, %s3680_s8  ;;  %p3686_p13 = scmp.lt.s32.totalorder %s3680_s8, %s3680_s8 }
  0x1d   :  { %p3687_p0 = por %p3686_p13, %p3685_p12 }
  0x1f   :  { %p3688_p1 = pnand %p3687_p0, %p3681_p11 }
  0x21   :  { %3691 = shalt.err (!%p3688_p1)
}
  0x22   :  { %22 = dma.hbm_to_vmem [thread:$0]  %s4038_s0, 256, %s3773_s15, [#allocation3], %s3744_s24, %s3744_s24, %s3745_s25  }
  0x23   :  { %s3746_s10 = smov [#allocation7]   ;;  %s3692_s14 = scalar_lea.hbm %s4040_s2, 256 }
  0x24   :  { %s40_s11 = sshll.u32 %s3746_s10, 4  ;;  %p3693_p2 = scmp.ne.s32.totalorder %s4040_s2, %s3692_s14  ;;  %s41_s11 = int_to_ptr.vmem [resolvable:$true] %s40_s11 }
  0x25   :  { %p3696_p3 = scmp.lt.u32.totalorder %s3692_s14, %s4040_s2 }
  0x27   :  { %p3698_p4 = pnand %p3696_p3, %p3693_p2 }
  0x29   :  { %3701 = shalt.err (!%p3698_p4)
}
  0x2a   :  { %s3702_s20 = scalar_lea.vmem %s41_s11, 256  ;;  %p3707_p6 = scmp.lt.s32.totalorder %s41_s11, %s41_s11 }
  0x2b   :  { %p3703_p5 = scmp.ne.s32.totalorder %s41_s11, %s3702_s20  ;;  %p3708_p7 = scmp.lt.s32.totalorder %s3702_s20, %s3702_s20 }
  0x2d   :  { %p3709_p8 = por %p3708_p7, %p3707_p6 }
  0x2f   :  { %p3710_p9 = pnand %p3709_p8, %p3703_p5 }
  0x31   :  { %3713 = shalt.err (!%p3710_p9)
}
  0x32   :  { %46 = dma.hbm_to_vmem [thread:$0]  %s4040_s2, 256, %s41_s11, [#allocation6], %s3744_s24, %s3744_s24, %s3745_s25  }
  0x33   :  { %3736 = dma.done.wait [#allocation3], 256  }
  0x34   :  { %3737 = vsyncadd [#allocation3], 4294967040 }
  0x35   :  { %3738 = dma.done.wait [#allocation6], 768  }
  0x36   :  { %3739 = vsyncadd [#allocation6], 4294966528  ;;  %vm64_vm0 = vcmask 261120   ;;  %v3825_v0 = vld [vmem:[#allocation5] sm:$0xff]  ;;  %v3827_v1 = vld [vmem:[#allocation5 + $0x8] sm:$0xff]  ;;  %v3747_v46 = vmov 0.0  }
  0x37   :  { %v3829_v2 = vld [vmem:[#allocation5 + $0x10] sm:$0xff]  ;;  %v72_v3 = vand.u32 4294901760, %v3825_v0  ;;  %v75_v4 = vand.u32 4294901760, %v3827_v1  ;;  %v3833_v5 = vld [vmem:[#allocation5 + $0x18] sm:$0xff]  ;;  %3271 = vmatprep.subr.mxu1 %v3747_v46  ;;  %vm3748_vm1 = vmmov 0   ;;  %v3883_v47 = vld [vmem:[#allocation7] sm:$0xff] }
  0x38   :  { %v78_v6 = vand.u32 4294901760, %v3829_v2  ;;  %v3836_v7 = vld [vmem:[#allocation2] sm:$0xff]  ;;  %v3838_v8 = vld [vmem:[#allocation2 + $0x8] sm:$0xff]  ;;  %v81_v9 = vand.u32 4294901760, %v3833_v5  ;;  %3273 = vmatprep.mubr.msk.f32.mxu1 %vm3748_vm1, %v3747_v46  ;;  %v3888_v51 = vld [vmem:[#allocation7 + $0x8] sm:$0xff]  ;;  %s3749_s2 = smov 96  }
  0x39   :  { %v66_v10 = vsel %vm64_vm0, %v3836_v7, 0  ;;  %v69_v11 = vsel %vm64_vm0, %v3838_v8, 0  ;;  %v3845_v12 = vpack.c.bf16 %v75_v4, %v72_v3  ;;  %v162_v15 = vsub.f32 %v3825_v0, %v72_v3  ;;  %s3750_s21 = smov 64   ;;  %s3751_s22 = smov 32  }
  0x3a   :  { %v3847_v13 = vand.u32 4294901760, %v66_v10  ;;  %v3849_v14 = vand.u32 4294901760, %v69_v11  ;;  %v3852_v16 = vpack.c.bf16 %v81_v9, %v78_v6  ;;  %v169_v17 = vsub.f32 %v3827_v1, %v75_v4  ;;  %s3752_s29 = smov [#allocation8]  }
  0x3b   :  { %v176_v18 = vsub.f32 %v3829_v2, %v78_v6  ;;  %v183_v19 = vsub.f32 %v3833_v5, %v81_v9  ;;  %3458 = vmatprep.subr.bf16.mxu0 %v3845_v12  ;;  %v163_v22 = vand.u32 4294901760, %v162_v15  ;;  %vm1061_vm5 = vcmask 64512   ;;  %s3072_s30 = sshll.u32 %s3752_s29, 4  ;;  %s3073_s30 = int_to_ptr.vmem [resolvable:$true] %s3072_s30 }
  0x3c   :  { %v141_v20 = vsub.f32 %v66_v10, %v3847_v13  ;;  %v151_v21 = vsub.f32 %v69_v11, %v3849_v14  ;;  %3460 = vmatpush3.bf16.msra.mxu0 %v3845_v12  ;;  %v170_v23 = vand.u32 4294901760, %v169_v17  ;;  %v3473_v42 = vpack.c.bf16 %v169_v17, %v162_v15  ;;  %s3714_s4 = scalar_lea.vmem %s3073_s30, 256  ;;  %p3719_p11 = scmp.lt.s32.totalorder %s3073_s30, %s3073_s30 }
  0x3d   :  { %v177_v24 = vand.u32 4294901760, %v176_v18  ;;  %v184_v25 = vand.u32 4294901760, %v183_v19  ;;  %3462 = vmatprep.subr.bf16.mxu0 %v3852_v16  ;;  %v164_v28 = vsub.f32 %v162_v15, %v163_v22  ;;  %v3477_v43 = vpack.c.bf16 %v183_v19, %v176_v18  ;;  %p3715_p10 = scmp.ne.s32.totalorder %s3073_s30, %s3714_s4  ;;  %p3720_p12 = scmp.lt.s32.totalorder %s3714_s4, %s3714_s4 }
  0x3e   :  { %v142_v26 = vand.u32 4294901760, %v141_v20  ;;  %v152_v27 = vand.u32 4294901760, %v151_v21  ;;  %v171_v29 = vsub.f32 %v169_v17, %v170_v23  ;;  %v3489_v44 = vpack.c.bf16 %v170_v23, %v163_v22 }
  0x3f   :  { %v178_v30 = vsub.f32 %v176_v18, %v177_v24  ;;  %v185_v31 = vsub.f32 %v183_v19, %v184_v25  ;;  %v165_v34 = vand.u32 4294901760, %v164_v28  ;;  %v3493_v45 = vpack.c.bf16 %v184_v25, %v177_v24  ;;  %p3721_p13 = por %p3720_p12, %p3719_p11 }
  0x40   :  { %v143_v32 = vsub.f32 %v141_v20, %v142_v26  ;;  %v153_v33 = vsub.f32 %v151_v21, %v152_v27  ;;  %3464 = vmatpush3.bf16.msra.mxu0 %v3852_v16  ;;  %v172_v35 = vand.u32 4294901760, %v171_v29 }
  0x41   :  { %v179_v36 = vand.u32 4294901760, %v178_v30  ;;  %v186_v37 = vand.u32 4294901760, %v185_v31  ;;  %p3722_p0 = pnand %p3721_p13, %p3715_p10 }
  0x42   :  { %v144_v38 = vand.u32 4294901760, %v143_v32  ;;  %v154_v39 = vand.u32 4294901760, %v153_v33  ;;  %v3465_v40 = vpack.c.bf16 %v172_v35, %v165_v34 }
  0x43   :  { %v3469_v41 = vpack.c.bf16 %v186_v37, %v179_v36 }
  0x44   :  { %3213 = vmatprep.mubr.f32.mxu0 %v144_v38  ;;  %3466 = vmatprep.subr.bf16.mxu0 %v3465_v40 }
  0x45   :  { %3214 = vmatmul.mubr.f32.vlgmr.msra.gmra.mrb[0].mxu0 %v154_v39 }
  0x46   :  { %3468 = vmatpush3.bf16.msra.mxu0 %v3465_v40  ;;  %3224 = vmatprep.mubr.f32.mxu0 %v3847_v13 }
  0x47   :  { %3470 = vmatprep.subr.bf16.mxu0 %v3469_v41 }
  0x4a   :  { %3472 = vmatpush3.bf16.msra.mxu0 %v3469_v41 }
  0x4b   :  { %3474 = vmatprep.subr.bf16.mxu0 %v3473_v42 }
  0x4d   :  { %3225 = vmatmul.mubr.f32.vlgmr.msra.gmra.mrb[0].mxu0 %v3849_v14 }
  0x4e   :  { %3476 = vmatpush3.bf16.msra.mxu0 %v3473_v42  ;;  %3235 = vmatprep.mubr.f32.mxu0 %v141_v20 }
  0x4f   :  { %3478 = vmatprep.subr.bf16.mxu0 %v3477_v43 }
  0x52   :  { %3480 = vmatpush3.bf16.msra.mxu0 %v3477_v43 }
  0x53   :  { %3482 = vmatprep.subr.bf16.mxu0 %v3845_v12 }
  0x55   :  { %3236 = vmatmul.mubr.f32.vlgmr.msra.gmra.mrb[0].mxu0 %v151_v21  ;;  %v599_v21 = vlaneseq }
  0x56   :  { %3484 = vmatpush3.bf16.msra.mxu0 %v3845_v12  ;;  %3246 = vmatprep.mubr.f32.mxu0 %v142_v26 }
  0x57   :  { %3486 = vmatprep.subr.bf16.mxu0 %v3852_v16  ;;  %v600_v22 = vshrl.u32 %v599_v21, 7  ;;  %v602_v23 = vand.u32 127, %v599_v21 }
  0x59   :  { %vm603_vm2 = vcmp.lt.s32.totalorder %v600_v22, 5  ;;  %vm604_vm3 = vcmp.lt.s32.totalorder %v602_v23, 5 }
  0x5a   :  { %3488 = vmatpush3.bf16.msra.mxu0 %v3852_v16  ;;  %vm605_vm4 = vmand %vm603_vm2, %vm604_vm3 }
  0x5b   :  { %3490 = vmatprep.subr.bf16.mxu0 %v3489_v44 }
  0x5d   :  { %3247 = vmatmul.mubr.f32.vlgmr.msra.gmra.mrb[0].mxu0 %v152_v27 }
  0x5e   :  { %3492 = vmatpush3.bf16.msra.mxu0 %v3489_v44  ;;  %3257 = vmatprep.mubr.f32.mxu0 %v3847_v13 }
  0x5f   :  { %3494 = vmatprep.subr.bf16.mxu0 %v3493_v45 }
  0x62   :  { %3496 = vmatpush3.bf16.msra.mxu0 %v3493_v45 }
  0x63   :  { %3498 = vmatprep.subr.bf16.mxu0 %v3845_v12 }
  0x65   :  { %3258 = vmatmul.mubr.f32.vlgmr.msra.gmra.mrb[0].mxu0 %v3849_v14 }
  0x66   :  { %3500 = vmatpush3.bf16.msra.mxu0 %v3845_v12  ;;  %3268 = vmatprep.mubr.f32.mxu0 %v3847_v13 }
  0x67   :  { %3502 = vmatprep.subr.bf16.mxu0 %v3852_v16 }
  0x6a   :  { %3504 = vmatpush3.bf16.msra.mxu0 %v3852_v16 }
  0x6b   :  { %3331 = vmatprep.subr.mxu0 %v3747_v46 }
  0x6d   :  { %3269 = vmatmul.mubr.f32.vlgmr.msra.gmra.mrb[0].mxu0 %v3849_v14 }
  0x6e   :  { %3333 = vmatprep.mubr.msk.f32.mxu0 %vm3748_vm1, %v3747_v46 }
 0x140   :  { %v3270_v48 = vpop.f32.mrb[0].mxu0 }
 0x141   :  { %v589_v49 = vpop.f32.mrb[1].mxu0  ;;  %v3892_v52 = vadd.f32 %v3270_v48, %v3888_v51 }
 0x142   :  { %v3886_v50 = vadd.f32 %v589_v49, %v3883_v47 }
 0x143   :  { %v1528_v55 = vsel %vm64_vm0, %v3892_v52, 0 }
 0x144   :  { %607 = vrot.lane.b32.xlu0 %v3886_v50, %s3749_s2  ;;  %v609_v53 = vsel %vm64_vm0, %v3886_v50, 0  ;;  %v3901_v56 = vand.u32 4294901760, %v1528_v55 }
 0x145   :  { %v3897_v54 = vand.u32 4294901760, %v609_v53 }
 0x146   :  { %v1599_v58 = vsub.f32 %v1528_v55, %v3901_v56 }
 0x147   :  { %v680_v57 = vsub.f32 %v609_v53, %v3897_v54 }
 0x148   :  { %1526 = vrot.lane.b32.xlu0 %v3892_v52, %s3749_s2  ;;  %v1600_v63 = vand.u32 4294901760, %v1599_v58 }
 0x149   :  { %v681_v59 = vand.u32 4294901760, %v680_v57 }
 0x14a   :  { %v1601_v11 = vsub.f32 %v1599_v58, %v1600_v63 }
 0x14b   :  { %v682_v62 = vsub.f32 %v680_v57, %v681_v59 }
 0x14c   :  { %v1602_v16 = vand.u32 4294901760, %v1601_v11 }
 0x14d   :  { %v683_v10 = vand.u32 4294901760, %v682_v62 }
 0x1b6   :  { %v608_v60 = vpop.permute.xlu0 %607 }
 0x1b7   :  { %v611_v61 = vsel %vm64_vm0, %v608_v60, 0 }
 0x1b8   :  { %v614_v3 = vand.u32 4294901760, %v611_v61 }
 0x1ba   :  { %v691_v4 = vsub.f32 %v611_v61, %v614_v3  ;;  %3272 = vmatpush3.xpose.msra.mxu1 %v614_v3  ;;  %v1527_v6 = vpop.permute.xlu0 %1526 }
 0x1bb   :  { %v1530_v9 = vsel %vm64_vm0, %v1527_v6, 0  ;;  %3276 = vmatprep.subr.mxu1 %v3747_v46 }
 0x1bc   :  { %v692_v12 = vand.u32 4294901760, %v691_v4  ;;  %v1533_v13 = vand.u32 4294901760, %v1530_v9 }
 0x1bd   :  { %3274 = vmatmul.mubr.f32.vlgmr.msra.gmra.mrb[0].mxu1 %v683_v10 }
 0x1be   :  { %v693_v14 = vsub.f32 %v691_v4, %v692_v12  ;;  %v1610_v15 = vsub.f32 %v1530_v9, %v1533_v13  ;;  %3332 = vmatpush3.xpose.msra.mxu0 %v1533_v13  ;;  %3278 = vmatprep.mubr.msk.f32.mxu1 %vm3748_vm1, %v3747_v46 }
 0x1bf   :  { %3336 = vmatprep.subr.mxu0 %v3747_v46 }
 0x1c0   :  { %v694_v17 = vand.u32 4294901760, %v693_v14  ;;  %v1611_v18 = vand.u32 4294901760, %v1610_v15 }
 0x1c1   :  { %3334 = vmatmul.mubr.f32.vlgmr.msra.gmra.mrb[2].mxu0 %v1602_v16 }
 0x1c2   :  { %v1612_v19 = vsub.f32 %v1610_v15, %v1611_v18  ;;  %3277 = vmatpush3.xpose.msra.mxu1 %v694_v17  ;;  %3338 = vmatprep.mubr.msk.f32.mxu0 %vm3748_vm1, %v3747_v46 }
 0x1c3   :  { %3281 = vmatprep.subr.mxu1 %v3747_v46 }
 0x1c4   :  { %v1613_v20 = vand.u32 4294901760, %v1612_v19 }
 0x1c5   :  { %3279 = vmatmul.mubr.f32.vlgmr.msra.gmra.mrb[0].mxu1 %v3897_v54 }
 0x1c6   :  { %3282 = vmatpush3.xpose.msra.mxu1 %v691_v4  ;;  %3337 = vmatpush3.xpose.msra.mxu0 %v1613_v20 }
 0x1c7   :  { %3341 = vmatprep.subr.mxu0 %v3747_v46  ;;  %3283 = vmatprep.mubr.msk.f32.mxu1 %vm3748_vm1, %v3747_v46 }
 0x1c8   :  { %3286 = vmatprep.subr.mxu1 %v3747_v46 }
 0x1c9   :  { %3339 = vmatmul.mubr.f32.vlgmr.msra.gmra.mrb[2].mxu0 %v3901_v56 }
 0x1ca   :  { %3342 = vmatpush3.xpose.msra.mxu0 %v1610_v15  ;;  %3343 = vmatprep.mubr.msk.f32.mxu0 %vm3748_vm1, %v3747_v46 }
 0x1cb   :  { %3346 = vmatprep.subr.mxu0 %v3747_v46 }
 0x1cd   :  { %3284 = vmatmul.mubr.f32.vlgmr.msra.gmra.mrb[0].mxu1 %v680_v57 }
 0x1ce   :  { %3287 = vmatpush3.xpose.msra.mxu1 %v614_v3  ;;  %3288 = vmatprep.mubr.msk.f32.mxu1 %vm3748_vm1, %v3747_v46 }
 0x1cf   :  { %3291 = vmatprep.subr.mxu1 %v3747_v46 }
 0x1d1   :  { %3344 = vmatmul.mubr.f32.vlgmr.msra.gmra.mrb[2].mxu0 %v1599_v58 }
 0x1d2   :  { %3347 = vmatpush3.xpose.msra.mxu0 %v1533_v13  ;;  %3348 = vmatprep.mubr.msk.f32.mxu0 %vm3748_vm1, %v3747_v46 }
 0x1d3   :  { %3351 = vmatprep.subr.mxu0 %v3747_v46 }
 0x1d5   :  { %3289 = vmatmul.mubr.f32.vlgmr.msra.gmra.mrb[0].mxu1 %v681_v59 }
 0x1d6   :  { %3292 = vmatpush3.xpose.msra.mxu1 %v692_v12  ;;  %3293 = vmatprep.mubr.msk.f32.mxu1 %vm3748_vm1, %v3747_v46 }
 0x1d7   :  { %3296 = vmatprep.subr.mxu1 %v3747_v46 }
 0x1d9   :  { %3349 = vmatmul.mubr.f32.vlgmr.msra.gmra.mrb[2].mxu0 %v1600_v63 }
 0x1da   :  { %3352 = vmatpush3.xpose.msra.mxu0 %v1611_v18  ;;  %3353 = vmatprep.mubr.msk.f32.mxu0 %vm3748_vm1, %v3747_v46 }
 0x1db   :  { %3356 = vmatprep.subr.mxu0 %v3747_v46 }
 0x1dd   :  { %3294 = vmatmul.mubr.f32.vlgmr.msra.gmra.mrb[0].mxu1 %v3897_v54 }
 0x1de   :  { %3297 = vmatpush3.xpose.msra.mxu1 %v614_v3  ;;  %3298 = vmatprep.mubr.msk.f32.mxu1 %vm3748_vm1, %v3747_v46 }
 0x1df   :  { %3301 = vmatprep.subr.mxu1 %v3747_v46 }
 0x1e1   :  { %3354 = vmatmul.mubr.f32.vlgmr.msra.gmra.mrb[2].mxu0 %v3901_v56 }
 0x1e2   :  { %3357 = vmatpush3.xpose.msra.mxu0 %v1533_v13  ;;  %3358 = vmatprep.mubr.msk.f32.mxu0 %vm3748_vm1, %v3747_v46 }
 0x1e5   :  { %3299 = vmatmul.mubr.f32.vlgmr.msra.gmra.mrb[0].mxu1 %v3897_v54 }
 0x1e6   :  { %3303 = vmatprep.mubr.msk.f32.mxu1 %vm3748_vm1, %v3747_v46 }
 0x1e9   :  { %3359 = vmatmul.mubr.f32.vlgmr.msra.gmra.mrb[2].mxu0 %v3901_v56 }
 0x2b8   :  { %v1055_v24 = vpop.f32.mrb[0].mxu1 }
 0x2b9   :  { %v1059_v25 = vmul.f32 0.35355338, %v1055_v24  ;;  %v3300_v26 = vpop.f32.mrb[1].mxu1 }
 0x2bb   :  { %v1060_v27 = vsel %vm605_vm4, %v1059_v25, -1e+09 }
 0x2bc   :  { %v1974_v28 = vpop.f32.mrb[2].mxu0  ;;  %v1062_v29 = vsel %vm1061_vm5, %v1060_v27, -inf }
 0x2bd   :  { %v1978_v30 = vmul.f32 0.35355338, %v1974_v28  ;;  %v3360_v31 = vpop.f32.mrb[3].mxu0  ;;  %1063 = vmax.xlane.f32.xlu1 %v1062_v29 }
 0x2bf   :  { %v1979_v32 = vsel %vm605_vm4, %v1978_v30, -1e+09 }
 0x2c0   :  { %v1980_v33 = vsel %vm1061_vm5, %v1979_v32, -inf }
 0x2c1   :  { %1981 = vmax.xlane.f32.xlu1 %v1980_v33 }
 0x2d2   :  { %1073 = vrot.lane.b32.xlu1 %v3886_v50, %s3750_s21 }
 0x34a   :  { %v1064_v34 = vpop.xlane.xlu1 %1063 }
 0x34b   :  { %v1065_v35 = vsub.f32 %v1060_v27, %v1064_v34 }
 0x34d   :  { %v1066_v36 = vmul.f32 1.442695, %v1065_v35 }
 0x34e   :  { %v1982_v37 = vpop.xlane.xlu1 %1981 }
 0x34f   :  { %3636 = vpow2.f32 %v1066_v36  ;;  %v1983_v38 = vsub.f32 %v1979_v32, %v1982_v37 }
 0x351   :  { %v1984_v39 = vmul.f32 1.442695, %v1983_v38 }
 0x352   :  { %v1074_v40 = vpop.permute.xlu1 %1073 }
 0x353   :  { %3638 = vpow2.f32 %v1984_v39  ;;  %v1080_v41 = vand.u32 4294901760, %v1074_v40 }
 0x355   :  { %3302 = vmatpush3.msra.mxu1 %v1080_v41  ;;  %v1157_v50 = vsub.f32 %v1074_v40, %v1080_v41 }
 0x356   :  { %3306 = vmatprep.subr.mxu1 %v3747_v46 }
 0x357   :  { %v1158_v55 = vand.u32 4294901760, %v1157_v50 }
 0x359   :  { %v3637_v42 = vpop.eup %3636 }
 0x35a   :  { %v1068_v43 = vsel %vm1061_vm5, %v3637_v42, 0.0 }
 0x35b   :  { %1069 = vadd.xlane.f32.xlu0 %v1068_v43 }
 0x35d   :  { %v3639_v44 = vpop.eup %3638 }
 0x35e   :  { %v1986_v45 = vsel %vm1061_vm5, %v3639_v44, 0.0 }
 0x35f   :  { %1987 = vadd.xlane.f32.xlu1 %v1986_v45 }
 0x370   :  { %2449 = vrot.lane.b32.xlu1 %v3827_v1, %s3751_s22  ;;  %v1159_v1 = vsub.f32 %v1157_v50, %v1158_v55 }
 0x371   :  { %1991 = vrot.lane.b32.xlu0 %v3892_v52, %s3750_s21 }
 0x372   :  { %v1160_v58 = vand.u32 4294901760, %v1159_v1 }
 0x374   :  { %2459 = vrot.lane.b32.xlu1 %v3888_v51, %s3751_s22 }
 0x375   :  { %2447 = vrot.lane.b32.xlu0 %v3825_v0, %s3751_s22 }
 0x379   :  { %2451 = vrot.lane.b32.xlu0 %v3829_v2, %s3751_s22 }
 0x37d   :  { %2453 = vrot.lane.b32.xlu0 %v3833_v5, %s3751_s22 }
 0x381   :  { %2457 = vrot.lane.b32.xlu0 %v3883_v47, %s3751_s22 }
 0x3e8   :  { %v1070_v48 = vpop.xlane.xlu0 %1069 }
 0x3e9   :  { %3640 = vrcp.f32 %v1070_v48 }
 0x3ec   :  { %v1988_v5 = vpop.xlane.xlu1 %1987  ;;  %v1992_v60 = vpop.permute.xlu0 %1991 }
 0x3ed   :  { %3642 = vrcp.f32 %v1988_v5  ;;  %v1998_v62 = vand.u32 4294901760, %v1992_v60 }
 0x3ef   :  { %v2075_v3 = vsub.f32 %v1992_v60, %v1998_v62 }
 0x3f0   :  { %v2448_v13 = vpop.permute.xlu0 %2447  ;;  %v2450_v14 = vpop.permute.xlu1 %2449 }
 0x3f1   :  { %v2076_v6 = vand.u32 4294901760, %v2075_v3  ;;  %v2469_v15 = vsel %vm64_vm0, %v2448_v13, 0  ;;  %v2471_v16 = vsel %vm64_vm0, %v2450_v14, 0 }
 0x3f2   :  { %v2478_v17 = vand.u32 4294901760, %v2469_v15  ;;  %v2481_v18 = vand.u32 4294901760, %v2471_v16 }
 0x3f3   :  { %v3641_v49 = vpop.eup %3640  ;;  %v2077_v10 = vsub.f32 %v2075_v3, %v2076_v6 }
 0x3f4   :  { %v1072_v53 = vmul.f32 %v3641_v49, %v3637_v42  ;;  %v3995_v19 = vpack.c.bf16 %v2481_v18, %v2478_v17  ;;  %v2452_v20 = vpop.permute.xlu0 %2451  ;;  %v2568_v28 = vsub.f32 %v2469_v15, %v2478_v17  ;;  %v2575_v29 = vsub.f32 %v2471_v16, %v2481_v18 }
 0x3f5   :  { %v2078_v12 = vand.u32 4294901760, %v2077_v10  ;;  %v2473_v21 = vsel %vm64_vm0, %v2452_v20, 0 }
 0x3f6   :  { %v1077_v52 = vsel %vm1061_vm5, %v1072_v53, 0  ;;  %v2484_v22 = vand.u32 4294901760, %v2473_v21  ;;  %3530 = vmatprep.subr.bf16.mxu0 %v3995_v19  ;;  %v2569_v30 = vand.u32 4294901760, %v2568_v28  ;;  %v2576_v31 = vand.u32 4294901760, %v2575_v29 }
 0x3f7   :  { %v1145_v54 = vand.u32 4294901760, %v1077_v52  ;;  %v3643_v47 = vpop.eup %3642  ;;  %3532 = vmatpush3.bf16.xpose.msra.mxu0 %v3995_v19  ;;  %v3521_v36 = vpack.c.bf16 %v2575_v29, %v2568_v28 }
 0x3f8   :  { %v1990_v51 = vmul.f32 %v3643_v47, %v3639_v44  ;;  %v2454_v23 = vpop.permute.xlu0 %2453  ;;  %v2570_v33 = vsub.f32 %v2568_v28, %v2569_v30  ;;  %v2577_v34 = vsub.f32 %v2575_v29, %v2576_v31  ;;  %v3537_v39 = vpack.c.bf16 %v2576_v31, %v2569_v30 }
 0x3f9   :  { %v1146_v0 = vsub.f32 %v1077_v52, %v1145_v54  ;;  %v2475_v24 = vsel %vm64_vm0, %v2454_v23, 0 }
 0x3fa   :  { %v1995_v59 = vsel %vm1061_vm5, %v1990_v51, 0  ;;  %v2487_v25 = vand.u32 4294901760, %v2475_v24  ;;  %v2571_v40 = vand.u32 4294901760, %v2570_v33 }
 0x3fb   :  { %v1147_v56 = vand.u32 4294901760, %v1146_v0  ;;  %v2063_v61 = vand.u32 4294901760, %v1995_v59 }
 0x3fc   :  { %v4003_v26 = vpack.c.bf16 %v2487_v25, %v2484_v22  ;;  %v2589_v27 = vsub.f32 %v2475_v24, %v2487_v25 }
 0x3fd   :  { %v1148_v57 = vsub.f32 %v1146_v0, %v1147_v56  ;;  %v2064_v63 = vsub.f32 %v1995_v59, %v2063_v61 }
 0x3fe   :  { %3534 = vmatprep.subr.bf16.mxu0 %v4003_v26  ;;  %v2590_v35 = vand.u32 4294901760, %v2589_v27 }
 0x3ff   :  { %v1149_v2 = vand.u32 4294901760, %v1148_v57  ;;  %v2065_v4 = vand.u32 4294901760, %v2064_v63  ;;  %3536 = vmatpush3.bf16.xpose.msra.mxu0 %v4003_v26 }
 0x400   :  { %v2591_v38 = vsub.f32 %v2589_v27, %v2590_v35  ;;  %3538 = vmatprep.subr.bf16.mxu0 %v3537_v39 }
 0x401   :  { %3304 = vmatmul.mubr.f32.vlgmr.msra.gmra.mrb[2].mxu1 %v1149_v2  ;;  %v2066_v9 = vsub.f32 %v2064_v63, %v2065_v4 }
 0x402   :  { %3307 = vmatpush3.msra.mxu1 %v1160_v58  ;;  %3308 = vmatprep.mubr.msk.f32.mxu1 %vm3748_vm1, %v3747_v46  ;;  %v2592_v48 = vand.u32 4294901760, %v2591_v38 }
 0x403   :  { %3311 = vmatprep.subr.mxu1 %v3747_v46  ;;  %v2067_v11 = vand.u32 4294901760, %v2066_v9 }
 0x409   :  { %3309 = vmatmul.mubr.f32.vlgmr.msra.gmra.mrb[2].mxu1 %v1145_v54 }
 0x40a   :  { %3312 = vmatpush3.msra.mxu1 %v1157_v50  ;;  %3313 = vmatprep.mubr.msk.f32.mxu1 %vm3748_vm1, %v3747_v46 }
 0x40b   :  { %3316 = vmatprep.subr.mxu1 %v3747_v46 }
 0x411   :  { %3314 = vmatmul.mubr.f32.vlgmr.msra.gmra.mrb[2].mxu1 %v1146_v0 }
 0x412   :  { %3317 = vmatpush3.msra.mxu1 %v1080_v41  ;;  %3318 = vmatprep.mubr.msk.f32.mxu1 %vm3748_vm1, %v3747_v46 }
 0x413   :  { %3321 = vmatprep.subr.mxu1 %v3747_v46 }
 0x419   :  { %3319 = vmatmul.mubr.f32.vlgmr.msra.gmra.mrb[2].mxu1 %v1147_v56 }
 0x41a   :  { %3322 = vmatpush3.msra.mxu1 %v1158_v55  ;;  %3323 = vmatprep.mubr.msk.f32.mxu1 %vm3748_vm1, %v3747_v46 }
 0x41b   :  { %3326 = vmatprep.subr.mxu1 %v3747_v46 }
 0x421   :  { %3324 = vmatmul.mubr.f32.vlgmr.msra.gmra.mrb[2].mxu1 %v1145_v54 }
 0x422   :  { %3327 = vmatpush3.msra.mxu1 %v1080_v41  ;;  %3328 = vmatprep.mubr.msk.f32.mxu1 %vm3748_vm1, %v3747_v46  ;;  %v2578_v41 = vand.u32 4294901760, %v2577_v34 }
 0x423   :  { %3361 = vmatprep.subr.mxu1 %v3747_v46 }
 0x424   :  { %v3513_v42 = vpack.c.bf16 %v2578_v41, %v2571_v40 }
 0x429   :  { %3329 = vmatmul.mubr.f32.vlgmr.msra.gmra.mrb[2].mxu1 %v1145_v54 }
 0x42a   :  { %3362 = vmatpush3.msra.mxu1 %v1998_v62  ;;  %3363 = vmatprep.mubr.msk.f32.mxu1 %vm3748_vm1, %v3747_v46 }
 0x42b   :  { %3366 = vmatprep.subr.mxu1 %v3747_v46 }
 0x42d   :  { %3364 = vmatmul.mubr.f32.vlgmr.msra.gmra.mrb[4].mxu1 %v2067_v11 }
 0x42e   :  { %3367 = vmatpush3.msra.mxu1 %v2078_v12  ;;  %3368 = vmatprep.mubr.msk.f32.mxu1 %vm3748_vm1, %v3747_v46 }
 0x42f   :  { %3371 = vmatprep.subr.mxu1 %v3747_v46 }
 0x435   :  { %3369 = vmatmul.mubr.f32.vlgmr.msra.gmra.mrb[4].mxu1 %v2063_v61 }
 0x436   :  { %3372 = vmatpush3.msra.mxu1 %v2075_v3  ;;  %3373 = vmatprep.mubr.msk.f32.mxu1 %vm3748_vm1, %v3747_v46  ;;  %v2458_v3 = vpop.permute.xlu0 %2457 }
 0x437   :  { %3376 = vmatprep.subr.mxu1 %v3747_v46 }
 0x43d   :  { %3374 = vmatmul.mubr.f32.vlgmr.msra.gmra.mrb[4].mxu1 %v2064_v63  ;;  %v2460_v63 = vpop.permute.xlu1 %2459 }
 0x43e   :  { %3377 = vmatpush3.msra.mxu1 %v1998_v62  ;;  %3378 = vmatprep.mubr.msk.f32.mxu1 %vm3748_vm1, %v3747_v46 }
 0x43f   :  { %3381 = vmatprep.subr.mxu1 %v3747_v46 }
 0x445   :  { %3379 = vmatmul.mubr.f32.vlgmr.msra.gmra.mrb[4].mxu1 %v2065_v4 }
 0x446   :  { %3382 = vmatpush3.msra.mxu1 %v2076_v6  ;;  %3383 = vmatprep.mubr.msk.f32.mxu1 %vm3748_vm1, %v3747_v46 }
 0x447   :  { %3386 = vmatprep.subr.mxu1 %v3747_v46 }
 0x44d   :  { %3384 = vmatmul.mubr.f32.vlgmr.msra.gmra.mrb[4].mxu1 %v2063_v61 }
 0x44e   :  { %3387 = vmatpush3.msra.mxu1 %v1998_v62  ;;  %3388 = vmatprep.mubr.msk.f32.mxu1 %vm3748_vm1, %v3747_v46  ;;  %v2582_v46 = vsub.f32 %v2473_v21, %v2484_v22 }
 0x44f   :  { %3506 = vmatprep.subr.bf16.mxu1 %v3995_v19 }
 0x450   :  { %v2583_v32 = vand.u32 4294901760, %v2582_v46  ;;  %v3525_v43 = vpack.c.bf16 %v2589_v27, %v2582_v46 }
 0x452   :  { %v2584_v37 = vsub.f32 %v2582_v46, %v2583_v32  ;;  %v3541_v44 = vpack.c.bf16 %v2590_v35, %v2583_v32 }
 0x454   :  { %v2585_v45 = vand.u32 4294901760, %v2584_v37 }
 0x455   :  { %3389 = vmatmul.mubr.f32.vlgmr.msra.gmra.mrb[4].mxu1 %v2063_v61 }
 0x456   :  { %3508 = vmatpush3.bf16.xpose.msra.mxu1 %v3995_v19  ;;  %v3517_v49 = vpack.c.bf16 %v2592_v48, %v2585_v45 }
 0x457   :  { %3510 = vmatprep.subr.bf16.mxu1 %v4003_v26 }
 0x45e   :  { %3512 = vmatpush3.bf16.xpose.msra.mxu1 %v4003_v26 }
 0x45f   :  { %3514 = vmatprep.subr.bf16.mxu1 %v3513_v42 }
 0x4fc   :  { %v1521_v50 = vpop.f32.mrb[2].mxu1 }
 0x4fd   :  { %v2464_v53 = vsel %vm64_vm0, %v1521_v50, 0  ;;  %v3330_v52 = vpop.f32.mrb[3].mxu1 }
 0x4fe   :  { %v2546_v54 = vand.u32 4294901760, %v2464_v53 }
 0x500   :  { %v2547_v55 = vsub.f32 %v2464_v53, %v2546_v54 }
 0x502   :  { %v2548_v0 = vand.u32 4294901760, %v2547_v55 }
 0x504   :  { %3432 = vmatprep.mubr.f32.mxu0 %v2548_v0  ;;  %v2549_v56 = vsub.f32 %v2547_v55, %v2548_v0 }
 0x506   :  { %v2550_v1 = vand.u32 4294901760, %v2549_v56 }
 0x508   :  { %3399 = vmatprep.mubr.f32.mxu1 %v2550_v1 }
 0x528   :  { %v2439_v57 = vpop.f32.mrb[4].mxu1 }
 0x529   :  { %v2467_v2 = vsel %vm64_vm0, %v2439_v57, 0  ;;  %v3390_v58 = vpop.f32.mrb[5].mxu1 }
 0x52a   :  { %v2556_v5 = vand.u32 4294901760, %v2467_v2 }
 0x52c   :  { %v2557_v47 = vsub.f32 %v2467_v2, %v2556_v5 }
 0x52e   :  { %v2558_v51 = vand.u32 4294901760, %v2557_v47 }
 0x530   :  { %v2559_v59 = vsub.f32 %v2557_v47, %v2558_v51  ;;  %3433 = vmatmul.mubr.f32.vlgmr.msra.gmra.mrb[4].mxu0 %v2558_v51 }
 0x531   :  { %3540 = vmatpush3.bf16.xpose.msra.mxu0 %v3537_v39  ;;  %3443 = vmatprep.mubr.f32.mxu0 %v2546_v54 }
 0x532   :  { %v2560_v60 = vand.u32 4294901760, %v2559_v59  ;;  %3542 = vmatprep.subr.bf16.mxu0 %v3541_v44 }
 0x534   :  { %3400 = vmatmul.mubr.f32.vlgmr.msra.gmra.mrb[6].mxu1 %v2560_v60 }
 0x535   :  { %3516 = vmatpush3.bf16.xpose.msra.mxu1 %v3513_v42  ;;  %3410 = vmatprep.mubr.f32.mxu1 %v2546_v54 }
 0x536   :  { %3518 = vmatprep.subr.bf16.mxu1 %v3517_v49 }
 0x539   :  { %3544 = vmatpush3.bf16.xpose.msra.mxu0 %v3541_v44 }
 0x53a   :  { %3546 = vmatprep.subr.bf16.mxu0 %v3995_v19 }
 0x53d   :  { %3520 = vmatpush3.bf16.xpose.msra.mxu1 %v3517_v49 }
 0x53e   :  { %3522 = vmatprep.subr.bf16.mxu1 %v3521_v36 }
 0x540   :  { %3444 = vmatmul.mubr.f32.vlgmr.msra.gmra.mrb[4].mxu0 %v2556_v5 }
 0x541   :  { %3548 = vmatpush3.bf16.xpose.msra.mxu0 %v3995_v19  ;;  %3454 = vmatprep.mubr.f32.mxu0 %v2546_v54 }
 0x542   :  { %3550 = vmatprep.subr.bf16.mxu0 %v4003_v26 }
 0x544   :  { %3411 = vmatmul.mubr.f32.vlgmr.msra.gmra.mrb[6].mxu1 %v2556_v5 }
 0x545   :  { %3524 = vmatpush3.bf16.xpose.msra.mxu1 %v3521_v36  ;;  %3421 = vmatprep.mubr.f32.mxu1 %v2547_v55 }
 0x546   :  { %3526 = vmatprep.subr.bf16.mxu1 %v3525_v43 }
 0x549   :  { %3552 = vmatpush3.bf16.xpose.msra.mxu0 %v4003_v26 }
 0x54d   :  { %3528 = vmatpush3.bf16.xpose.msra.mxu1 %v3525_v43 }
 0x550   :  { %3455 = vmatmul.mubr.f32.vlgmr.msra.gmra.mrb[4].mxu0 %v2556_v5 }
 0x554   :  { %3422 = vmatmul.mubr.f32.vlgmr.msra.gmra.mrb[6].mxu1 %v2557_v47 }
 0x623   :  { %v3456_v61 = vpop.f32.mrb[4].mxu0 }
 0x624   :  { %v2995_v62 = vpop.f32.mrb[5].mxu0 }
 0x627   :  { %v3423_v4 = vpop.f32.mrb[6].mxu1 }
 0x628   :  { %v3555_v6 = vadd.f32 %v3423_v4, %v2460_v63  ;;  %v2739_v9 = vpop.f32.mrb[7].mxu1 }
 0x629   :  { %v3557_v10 = vadd.f32 %v2739_v9, %v2458_v3 }
 0x62a   :  { %v3556_v11 = vadd.f32 %v3555_v6, %v3456_v61 }
 0x62b   :  { %v3558_v12 = vadd.f32 %v3557_v10, %v2995_v62 }
 0x62c   :  { %v3006_v15 = vadd.f32 %v3556_v11, %v3838_v8 }
 0x62d   :  { %v3005_v13 = vadd.f32 %v3558_v12, %v3836_v7 }
 0x62e   :  { %v3037_v16 = vsel %vm64_vm0, %v3006_v15, 0.0 }
 0x62f   :  { %v3007_v14 = vsel %vm64_vm0, %v3005_v13, 0.0 }
 0x630   :  { %3008 = vadd.xlane.f32.xlu0 %v3007_v14 }
 0x634   :  { %3038 = vadd.xlane.f32.xlu0 %v3037_v16 }
 0x6bd   :  { %v3009_v17 = vpop.xlane.xlu0 %3008 }
 0x6be   :  { %v3010_v18 = vrot.slane %v3009_v17, 4 }
 0x6c0   :  { %v3011_v19 = vadd.f32 %v3010_v18, %v3009_v17 }
 0x6c1   :  { %v3039_v8 = vpop.xlane.xlu0 %3038 }
 0x6c2   :  { %v3012_v20 = vrot.slane %v3011_v19, 2  ;;  %v3040_v27 = vrot.slane %v3039_v8, 4 }
 0x6c4   :  { %v3013_v21 = vadd.f32 %v3012_v20, %v3011_v19  ;;  %v3041_v28 = vadd.f32 %v3040_v27, %v3039_v8 }
 0x6c6   :  { %v3014_v22 = vrot.slane %v3013_v21, 1  ;;  %v3042_v29 = vrot.slane %v3041_v28, 2 }
 0x6c8   :  { %v3015_v46 = vadd.f32 %v3014_v22, %v3013_v21  ;;  %v3043_v33 = vadd.f32 %v3042_v29, %v3041_v28 }
 0x6ca   :  { %3617 = vpush %v3015_v46  ;;  %v3044_v36 = vrot.slane %v3043_v33, 1 }
 0x6cc   :  { %v3045_v39 = vadd.f32 %v3044_v36, %v3043_v33 }
 0x6fb   :  { %s3618_s23 = spop %3617 }
 0x6fc   :  { %v3017_v23 = vstv %s3618_s23 }
 0x6fd   :  { %v3018_v24 = vmul.f32 0.00390625, %v3017_v23 }
 0x6ff   :  { %v3019_v7 = vsub.f32 %v3005_v13, %v3018_v24 }
 0x701   :  { %v3020_v25 = vmul.f32 %v3019_v7, %v3019_v7 }
 0x703   :  { %v3021_v26 = vsel %vm64_vm0, %v3020_v25, 0.0 }
 0x704   :  { %3022 = vadd.xlane.f32.xlu1 %v3021_v26 }
 0x791   :  { %v3023_v30 = vpop.xlane.xlu1 %3022 }
 0x792   :  { %v3024_v31 = vrot.slane %v3023_v30, 4 }
 0x794   :  { %v3025_v32 = vadd.f32 %v3024_v31, %v3023_v30 }
 0x796   :  { %v3026_v34 = vrot.slane %v3025_v32, 2 }
 0x798   :  { %v3027_v35 = vadd.f32 %v3026_v34, %v3025_v32 }
 0x79a   :  { %v3028_v37 = vrot.slane %v3027_v35, 1 }
 0x79c   :  { %v3029_v38 = vadd.f32 %v3028_v37, %v3027_v35 }
 0x79e   :  { %3619 = vpush %v3029_v38 }
 0x79f   :  { %3621 = vpush %v3045_v39 }
 0x7cf   :  { %s3620_s26 = spop %3619 }
 0x7d0   :  { %v3031_v40 = vstv %s3620_s26  ;;  %s3622_s27 = spop %3621 }
 0x7d1   :  { %v3032_v41 = vmul.f32 0.00390625, %v3031_v40  ;;  %v3047_v42 = vstv %s3622_s27 }
 0x7d2   :  { %v3048_v43 = vmul.f32 0.00390625, %v3047_v42 }
 0x7d3   :  { %v3033_v44 = vadd.f32 1e-05, %v3032_v41 }
 0x7d4   :  { %v3049_v45 = vsub.f32 %v3006_v15, %v3048_v43 }
 0x7d5   :  { %3644 = vrsqrt.f32 %v3033_v44 }
 0x7d6   :  { %v3050_v48 = vmul.f32 %v3049_v45, %v3049_v45 }
 0x7d8   :  { %v3051_v49 = vsel %vm64_vm0, %v3050_v48, 0.0 }
 0x7d9   :  { %3052 = vadd.xlane.f32.xlu0 %v3051_v49 }
 0x7df   :  { %v3645_v50 = vpop.eup %3644 }
 0x7e0   :  { %v3035_v53 = vmul.f32 %v3645_v50, %v3019_v7 }
 0x7e2   :  { %3036 = vst.msk [vmem:[#allocation8] sm:$0xff] %vm64_vm0, %v3035_v53 }
 0x866   :  { %v3053_v52 = vpop.xlane.xlu0 %3052 }
 0x867   :  { %v3054_v54 = vrot.slane %v3053_v52, 4 }
 0x869   :  { %v3055_v55 = vadd.f32 %v3054_v54, %v3053_v52 }
 0x86b   :  { %v3056_v0 = vrot.slane %v3055_v55, 2 }
 0x86d   :  { %v3057_v56 = vadd.f32 %v3056_v0, %v3055_v55 }
 0x86f   :  { %v3058_v1 = vrot.slane %v3057_v56, 1 }
 0x871   :  { %v3059_v57 = vadd.f32 %v3058_v1, %v3057_v56 }
 0x873   :  { %3623 = vpush %v3059_v57 }
 0x8a4   :  { %s3624_s28 = spop %3623 }
 0x8a5   :  { %v3061_v2 = vstv %s3624_s28 }
 0x8a6   :  { %v3062_v58 = vmul.f32 0.00390625, %v3061_v2 }
 0x8a8   :  { %v3063_v5 = vadd.f32 1e-05, %v3062_v58 }
 0x8aa   :  { %3646 = vrsqrt.f32 %v3063_v5 }
 0x8b4   :  { %v3647_v47 = vpop.eup %3646 }
 0x8b5   :  { %v3065_v51 = vmul.f32 %v3647_v47, %v3049_v45 }
 0x8b7   :  { %3066 = vst.msk [vmem:[#allocation8 + $0x8] sm:$0xff] %vm64_vm0, %v3065_v51 }
 0x8b8   :  { %3725 = shalt.err (!%p3722_p0)
}
 0x8b9   :  { %s3726_s7 = scalar_lea.hbm %s4041_s3, 256 }
 0x8ba   :  { %p3727_p1 = scmp.ne.s32.totalorder %s4041_s3, %s3726_s7  ;;  %p3730_p2 = scmp.lt.u32.totalorder %s3726_s7, %s4041_s3 }
 0x8bc   :  { %p3732_p3 = pnand %p3730_p2, %p3727_p1 }
 0x8be   :  { %3735 = shalt.err (!%p3732_p3)
}
 0x8bf   :  { %3078 = dma.vmem_to_hbm [thread:$0]  %s3073_s30, 256, %s4041_s3, [#allocation4], %s3744_s24, %s3744_s24, %s3745_s25  }
 0x8c0   :  { %3740 = dma.done.wait [#allocation4], 256  }
 0x8c1   :  { %3741 = vsyncadd [#allocation4], 4294967040 }
 0x8c2   :  { %3082 = vsyncpa [#allocation3], 1 }
 0x8c3   :  { %3083 = vsyncpa [#allocation6], 1 }
 0x8c4   :  { %3084 = vsyncpa [#allocation4], 1 }

</bundles_post_ra>
